<compile_context>
chip_gen: v7x
topology: tpu7x:2x2x1
jax: 0.10.0
libtpu: 0.0.40
codegen_flags: <defaults>
</compile_context>

<pallas_src>
import functools

import jax
import jax.numpy as jnp
from jax import lax
from jax.experimental import pallas as pl
from jax.experimental.pallas import tpu as pltpu

NUM_CLASSES = 5

_X_TILE_TARGET_BYTES = 2 * 1024 * 1024   # ~2 MiB x tile (1-4 MiB sweet spot)
_MIN_TILE_ROWS = 8
_MAX_TILE_ROWS = 4096


# ----------------------------- kernels ------------------------------------ #

def _predict_kernel(x_ref, wt_ref, b_ref, ypred_ref):
    # logits = x @ W^T + b  (MXU matmul, f32 accumulate); bias broadcast over rows.
    logits = jnp.dot(
        x_ref[...], wt_ref[...], preferred_element_type=jnp.float32
    ) + b_ref[...]
    # softmax over the class axis (dim=1 in the PyTorch module)
    m = jnp.max(logits, axis=-1, keepdims=True)
    e = jnp.exp(logits - m)
    s = jnp.sum(e, axis=-1, keepdims=True)
    ypred_ref[...] = (e / s).astype(ypred_ref.dtype)
    # Rows of a ragged last tile that lie past the true batch are dropped by
    # Pallas' masked output write, so no in-kernel masking is needed here.


def _train_kernel(x_ref, wt_ref, b_ref, lab_ref, ypred_ref, loss_ref,
                  *, batch, tile_rows):
    logits = jnp.dot(
        x_ref[...], wt_ref[...], preferred_element_type=jnp.float32
    ) + b_ref[...]

    m = jnp.max(logits, axis=-1, keepdims=True)
    e = jnp.exp(logits - m)
    s = jnp.sum(e, axis=-1, keepdims=True)
    ypred_ref[...] = (e / s).astype(ypred_ref.dtype)

    # cross-entropy on the logits (matches nn.functional.cross_entropy):
    #   nll_i = logsumexp(logits_i) - logits_i[y_i]
    lse = m + jnp.log(s)                                # (tb, 1)
    labels = lab_ref[...]                               # (tb, 1) int32
    cls = lax.broadcasted_iota(jnp.int32, logits.shape, 1)
    picked = jnp.sum(jnp.where(cls == labels, logits, 0.0),
                     axis=-1, keepdims=True)            # (tb, 1)

    # Mask rows of the ragged last tile (x is NOT padded in HBM; their content
    # is undefined).  `batch` is a static Python int closed over at trace time.
    row = (pl.program_id(0) * tile_rows
           + lax.broadcasted_iota(jnp.int32, lse.shape, 0))
    nll = jnp.where(row < batch, lse - picked, 0.0)     # (tb, 1)

    # Per-tile partial sum, broadcast into an (8,128)-aligned slab so the store
    # is a plain aligned vst; the wrapper reads [:, 0, 0] and reduces.
    tile_loss = jnp.sum(nll, keepdims=True)             # (1, 1)
    loss_ref[...] = jnp.broadcast_to(
        tile_loss.reshape(1, 1, 1), loss_ref.shape).astype(loss_ref.dtype)


# ----------------------------- sizing helpers ------------------------------ #

def _tile_rows(batch, in_dim, max_rows=_MAX_TILE_ROWS):
    """Rows per batch tile: sized so one f32 x tile is ~_X_TILE_TARGET_BYTES,
    multiple of 8, clamped to [8, max_rows].  If the whole batch fits in one
    tile, use the exact batch size (a block equal to the full dim needs no
    8-alignment)."""
    rows = _X_TILE_TARGET_BYTES // max(4 * in_dim, 1)
    rows = max(_MIN_TILE_ROWS, min(max_rows, (rows // 8) * 8))
    if batch <= rows:
        return batch
    return rows


def _vmem_limit_bytes(tb, in_dim):
    """Explicit scoped-VMEM budget: double-buffered x tile + lane-padded
    weight/bias/outputs + headroom.  Capped at 48 MiB (safe on v7x's 64 MiB
    physical VMEM; v5e's 16 MiB default would otherwise reject big tiles)."""
    rows = max(tb, 8)
    x_buf = 2 * rows * in_dim * 4            # double-buffered x tile
    w_buf = 2 * in_dim * 128 * 4             # (in_dim, 5) lane-pads to 128
    b_buf = 2 * 8 * 128 * 4
    y_buf = 2 * rows * 128 * 4               # y_pred tile, lane-padded
    lab_buf = 2 * rows * 128 * 4
    loss_buf = 2 * 8 * 128 * 4
    need = x_buf + w_buf + b_buf + y_buf + lab_buf + loss_buf + (4 << 20)
    limit = max(need, 16 << 20)
    if need <= (48 << 20):
        limit = min(limit, 48 << 20)
    return int(limit)


# ----------------------------- wrappers ------------------------------------ #

def _predict(x, wt, b2, max_tile_rows=_MAX_TILE_ROWS):
    batch, in_dim = x.shape
    tb = _tile_rows(batch, in_dim, max_tile_rows)
    num_tiles = -(-batch // tb)
    y_pred = pl.pallas_call(
        _predict_kernel,
        out_shape=jax.ShapeDtypeStruct((batch, NUM_CLASSES), jnp.float32),
        grid=(num_tiles,),
        in_specs=[
            pl.BlockSpec((tb, in_dim), lambda i: (i, 0)),
            pl.BlockSpec((in_dim, NUM_CLASSES), lambda i: (0, 0)),  # VMEM-resident
            pl.BlockSpec((1, NUM_CLASSES), lambda i: (0, 0)),       # VMEM-resident
        ],
        out_specs=pl.BlockSpec((tb, NUM_CLASSES), lambda i: (i, 0)),
        compiler_params=pltpu.CompilerParams(
            dimension_semantics=("parallel",),       # shard batch tiles across TCs
            vmem_limit_bytes=_vmem_limit_bytes(tb, in_dim)),
        cost_estimate=pl.CostEstimate(
            flops=2 * batch * in_dim * NUM_CLASSES,
            transcendentals=batch * NUM_CLASSES,
            bytes_accessed=4 * (batch * in_dim + batch * NUM_CLASSES
                                + in_dim * NUM_CLASSES + NUM_CLASSES)),
    )(x, wt, b2)
    return y_pred


def _train_forward(x, wt, b2, y, max_tile_rows=_MAX_TILE_ROWS):
    batch, in_dim = x.shape
    tb = _tile_rows(batch, in_dim, max_tile_rows)
    num_tiles = -(-batch // tb)
    labels = y.reshape(batch, 1).astype(jnp.int32)
    kernel = functools.partial(_train_kernel, batch=batch, tile_rows=tb)
    y_pred, partials = pl.pallas_call(
        kernel,
        out_shape=(
            jax.ShapeDtypeStruct((batch, NUM_CLASSES), jnp.float32),   # y_pred
            jax.ShapeDtypeStruct((num_tiles, 8, 128), jnp.float32),    # per-tile nll sums
        ),
        grid=(num_tiles,),
        in_specs=[
            pl.BlockSpec((tb, in_dim), lambda i: (i, 0)),
            pl.BlockSpec((in_dim, NUM_CLASSES), lambda i: (0, 0)),
            pl.BlockSpec((1, NUM_CLASSES), lambda i: (0, 0)),
            pl.BlockSpec((tb, 1), lambda i: (i, 0)),                   # raw int32 labels
        ],
        out_specs=(
            pl.BlockSpec((tb, NUM_CLASSES), lambda i: (i, 0)),
            pl.BlockSpec((1, 8, 128), lambda i: (i, 0, 0)),            # per-tile partial
        ),
        compiler_params=pltpu.CompilerParams(
            dimension_semantics=("parallel",),       # loss is per-tile => parallel OK
            vmem_limit_bytes=_vmem_limit_bytes(tb, in_dim)),
        cost_estimate=pl.CostEstimate(
            flops=2 * batch * in_dim * NUM_CLASSES + 10 * batch * NUM_CLASSES,
            transcendentals=batch * (NUM_CLASSES + 1),
            bytes_accessed=4 * (batch * in_dim + batch * NUM_CLASSES + batch
                                + in_dim * NUM_CLASSES + NUM_CLASSES
                                + num_tiles * 8 * 128)),
    )(x, wt, b2, labels)
    loss = partials[:, 0, 0].sum() / batch   # cross_entropy default 'mean' reduction
    return loss, y_pred


def torch_model_forward(x, wt, b2, y=None, max_tile_rows=_MAX_TILE_ROWS):
    """x: (B, input_size) f32; wt: (input_size, 5) pre-transposed weight;
    b2: (1, 5) bias; y: optional (B,) int32 class labels."""
    if y is None:
        return _predict(x, wt, b2, max_tile_rows)
    return _train_forward(x, wt, b2, y, max_tile_rows)


# ------------------------------- demo -------------------------------------- #

if __name__ == "__main__":
    key = jax.random.PRNGKey(0)
    kx, kw, kb, ky, kx2, ky2 = jax.random.split(key, 6)

    batch = 8
    input_size = 32

    x = jax.random.normal(kx, (batch, input_size), dtype=jnp.float32)
    # Deterministic "Linear(input_size, 5)" parameters (synthetic init).
    w = jax.random.normal(kw, (NUM_CLASSES, input_size), dtype=jnp.float32) * 0.1
    b = jax.random.normal(kb, (NUM_CLASSES,), dtype=jnp.float32) * 0.1
    y = jax.random.randint(ky, (batch,), 0, NUM_CLASSES, dtype=jnp.int32)

    # Parameter prep done ONCE, outside the hot forward path.
    wt = jnp.asarray(w.T)                       # (input_size, 5)
    b2 = jnp.asarray(b).reshape(1, NUM_CLASSES)

    def ref_forward(xv, yv=None):
        logits = xv @ w.T + b
        yp = jax.nn.softmax(logits, axis=1)
        if yv is None:
            return yp
        lse = jax.scipy.special.logsumexp(logits, axis=1)
        loss = jnp.mean(lse - logits[jnp.arange(xv.shape[0]), yv])
        return loss, yp

    # ---- main check: single-tile path -------------------------------------
    y_pred = jax.block_until_ready(torch_model_forward(x, wt, b2))
    loss, y_pred2 = torch_model_forward(x, wt, b2, y)
    loss = jax.block_until_ready(loss)
    y_pred2 = jax.block_until_ready(y_pred2)

    y_pred_ref = ref_forward(x)
    loss_ref, _ = ref_forward(x, y)
    assert jnp.allclose(y_pred, y_pred_ref, atol=1e-5)
    assert jnp.allclose(y_pred2, y_pred_ref, atol=1e-5)
    assert jnp.allclose(loss, loss_ref, atol=1e-5)

    # ---- extra check: multi-tile + ragged last tile (forced 8-row tiles) ---
    batch2 = 13
    x2 = jax.random.normal(kx2, (batch2, input_size), dtype=jnp.float32)
    y2 = jax.random.randint(ky2, (batch2,), 0, NUM_CLASSES, dtype=jnp.int32)

    yp_small = jax.block_until_ready(
        torch_model_forward(x2, wt, b2, max_tile_rows=8))
    loss_small, yp2_small = torch_model_forward(x2, wt, b2, y2, max_tile_rows=8)
    loss_small = jax.block_until_ready(loss_small)
    yp2_small = jax.block_until_ready(yp2_small)

    yp_small_ref = ref_forward(x2)
    loss_small_ref, _ = ref_forward(x2, y2)
    assert jnp.allclose(yp_small, yp_small_ref, atol=1e-5)
    assert jnp.allclose(yp2_small, yp_small_ref, atol=1e-5)
    assert jnp.allclose(loss_small, loss_small_ref, atol=1e-5)

    print("KERNEL_OK")
</pallas_src>

<mosaic_0001>
module attributes {stable_mosaic.version = 11 : i64} {
  func.func @_predict_kernel(%arg0: i32, %arg1: memref<8x32xf32, #tpu.memory_space<vmem>>, %arg2: memref<32x5xf32, #tpu.memory_space<vmem>>, %arg3: memref<1x5xf32, #tpu.memory_space<vmem>>, %arg4: memref<8x5xf32, #tpu.memory_space<vmem>>) attributes {dimension_semantics = [#tpu.dimension_semantics<parallel>], iteration_bounds = array<i64: 1>, scalar_prefetch = 0 : i64, scratch_operands = 0 : i64, tpu.core_type = #tpu.core_type<tc>, window_params = [{transform_indices = @transform_0, window_bounds = array<i64: 8, 32>}, {pipeline_mode = #tpu.pipeline_mode<synchronous>, transform_indices = @transform_1, window_bounds = array<i64: 32, 5>}, {pipeline_mode = #tpu.pipeline_mode<synchronous>, transform_indices = @transform_2, window_bounds = array<i64: 1, 5>}, {transform_indices = @transform_3, window_bounds = array<i64: 8, 5>}]} {
    %c0 = arith.constant 0 : index
    %c0_0 = arith.constant 0 : index
    %0 = vector.load %arg1[%c0, %c0_0] : memref<8x32xf32, #tpu.memory_space<vmem>>, vector<8x32xf32>
    %c0_1 = arith.constant 0 : index
    %c0_2 = arith.constant 0 : index
    %1 = vector.load %arg2[%c0_1, %c0_2] : memref<32x5xf32, #tpu.memory_space<vmem>>, vector<32x5xf32>
    %cst = arith.constant dense<0.000000e+00> : vector<8x5xf32>
    %2 = tpu.matmul %0, %1, %cst {dimension_numbers = #tpu.dot_dimension_numbers<[1], [0], [0], [1], [0, 0, 1, 1], [], []>} : vector<8x32xf32>, vector<32x5xf32>, vector<8x5xf32> -> vector<8x5xf32>
    %c0_3 = arith.constant 0 : index
    %c0_4 = arith.constant 0 : index
    %3 = vector.load %arg3[%c0_3, %c0_4] : memref<1x5xf32, #tpu.memory_space<vmem>>, vector<1x5xf32>
    %4 = vector.broadcast %3 : vector<1x5xf32> to vector<8x5xf32>
    %5 = arith.addf %2, %4 : vector<8x5xf32>
    %cst_5 = arith.constant dense<0xFF800000> : vector<8xf32>
    %6 = vector.multi_reduction <maximumf>, %5, %cst_5 [1] : vector<8x5xf32> to vector<8xf32>
    %7 = vector.shape_cast %6 : vector<8xf32> to vector<8x1xf32>
    %8 = vector.broadcast %7 : vector<8x1xf32> to vector<8x5xf32>
    %9 = arith.subf %5, %8 : vector<8x5xf32>
    %10 = math.exp %9 : vector<8x5xf32>
    %cst_6 = arith.constant dense<0.000000e+00> : vector<8xf32>
    %11 = vector.multi_reduction <add>, %10, %cst_6 [1] : vector<8x5xf32> to vector<8xf32>
    %12 = vector.shape_cast %11 : vector<8xf32> to vector<8x1xf32>
    %13 = vector.broadcast %12 : vector<8x1xf32> to vector<8x5xf32>
    %14 = arith.divf %10, %13 : vector<8x5xf32>
    %c0_7 = arith.constant 0 : index
    %c0_8 = arith.constant 0 : index
    %15 = vector.load %arg4[%c0_7, %c0_8] : memref<8x5xf32, #tpu.memory_space<vmem>>, vector<8x5xf32>
    tpu.vector_store %arg4[%c0_7, %c0_8], %14 {strides = array<i32>} : memref<8x5xf32, #tpu.memory_space<vmem>>, vector<8x5xf32>,
    return
  }
  func.func @transform_0(%arg0: i32) -> (i32, i32) {
    %c0_i32 = arith.constant 0 : i32
    %c0_i32_0 = arith.constant 0 : i32
    return %arg0, %c0_i32 : i32, i32
  }
  func.func @transform_1(%arg0: i32) -> (i32, i32) {
    %c0_i32 = arith.constant 0 : i32
    %c0_i32_0 = arith.constant 0 : i32
    %c0_i32_1 = arith.constant 0 : i32
    return %c0_i32, %c0_i32_0 : i32, i32
  }
  func.func @transform_2(%arg0: i32) -> (i32, i32) {
    %c0_i32 = arith.constant 0 : i32
    %c0_i32_0 = arith.constant 0 : i32
    %c0_i32_1 = arith.constant 0 : i32
    return %c0_i32, %c0_i32_0 : i32, i32
  }
  func.func @transform_3(%arg0: i32) -> (i32, i32) {
    %c0_i32 = arith.constant 0 : i32
    %c0_i32_0 = arith.constant 0 : i32
    return %arg0, %c0_i32 : i32, i32
  }
}

</mosaic_0001>

<bundles_post_ra>
// kernel: tpu_custom_call.1
= control target key start
LH: loop header
LB: loop body
LE: loop exit
PB: predicated region body
PF: predicated region fallthrough
CT: control target
= control target key end

     0   :  { %v184_v3 = vmov 0.0|0.0   ;;  %vm185_vm0 = vmmov 0   ;;  %v186_v6 = vmov 0.0   ;;  %s241_s0 = inlined_call_operand.vmem [shape: f32[8,32], index: 0, kind: input, shape index: {}]   ;;  %s242_s1 = inlined_call_operand.vmem [shape: f32[32,5], index: 1, kind: input, shape index: {}]   ;;  %s243_s2 = inlined_call_operand.vmem [shape: f32[1,5], index: 2, kind: input, shape index: {}]   ;;  %s244_s3 = inlined_call_operand.hbm [shape: f32[8,5], index: 3, kind: output, shape index: {}]  }
   0x1   :  { %v16_v0 = vld [vmem:[%s242_s1] sm:$0xff]  ;;  %v17_v1 = vld [vmem:[%s242_s1 + $0x8] sm:$0xff]  ;;  %v18_v2 = vld [vmem:[%s242_s1 + $0x10] sm:$0xff]  ;;  %146 = vmatprep.subr.bf16.mxu0 %v184_v3  ;;  %143 = vmatprep.mubr.msk.f32.mxu0 %vm185_vm0, %v186_v6 }
   0x2   :  { %v147_v4 = vpack.c.bf16 %v17_v1, %v16_v0  ;;  %v19_v5 = vld [vmem:[%s242_s1 + $0x18] sm:$0xff] }
   0x3   :  { %8 = vsyncpa [#allocation3], 0  ;;  %v150_v7 = vpack.c.bf16 %v19_v5, %v18_v2  ;;  %v15_v8 = vld [vmem:[%s241_s0] sm:$0xff]  ;;  %vm27_vm1 = vcmask 261120   ;;  %vm101_vm2 = vcmask 39936   ;;  %s187_s0 = smov [#allocation2]  }
   0x4   :  { %148 = vmatpush3.bf16.msra.mxu0 %v147_v4  ;;  %v128_v9 = vld [vmem:[%s243_s2] ss:$0 sm:$0xff]  ;;  %s120_s1 = sshll.u32 %s187_s0, 4  ;;  %s121_s1 = int_to_ptr.vmem [resolvable:$true] %s120_s1 }
   0x5   :  { %149 = vmatprep.subr.bf16.mxu0 %v184_v3  ;;  %s160_s2 = scalar_lea.vmem %s121_s1, 128  ;;  %p165_p1 = scmp.lt.s32.totalorder %s121_s1, %s121_s1 }
   0x6   :  { %p161_p0 = scmp.ne.s32.totalorder %s121_s1, %s160_s2  ;;  %p166_p2 = scmp.lt.s32.totalorder %s160_s2, %s160_s2 }
   0x8   :  { %151 = vmatpush3.bf16.msra.mxu0 %v150_v7  ;;  %p167_p3 = por %p166_p2, %p165_p1 }
   0xa   :  { %p168_p4 = pnand %p167_p3, %p161_p0 }
   0xb   :  { %144 = vmatmul.mubr.msk.f32.vlgmr.msra.gmra.mrb[0].mxu0 %vm27_vm1, %v15_v8 }
  0xde   :  { %v97_v10 = vpop.f32.mrb[0].mxu0 }
  0xdf   :  { %v98_v11 = vadd.f32 %v128_v9, %v97_v10  ;;  %v145_v12 = vpop.f32.mrb[1].mxu0 }
  0xe1   :  { %v102_v13 = vsel %vm101_vm2, %v98_v11, -inf }
  0xe2   :  { %103 = vmax.xlane.f32.xlu0 %v102_v13 }
 0x16f   :  { %v104_v14 = vpop.xlane.xlu0 %103 }
 0x170   :  { %v105_v15 = vsub.f32 %v98_v11, %v104_v14 }
 0x172   :  { %v106_v16 = vmul.f32 1.442695, %v105_v15 }
 0x174   :  { %156 = vpow2.f32 %v106_v16 }
 0x17e   :  { %v157_v17 = vpop.eup %156 }
 0x17f   :  { %v108_v18 = vsel %vm101_vm2, %v157_v17, 0.0 }
 0x180   :  { %109 = vadd.xlane.f32.xlu0 %v108_v18 }
 0x20d   :  { %v110_v19 = vpop.xlane.xlu0 %109 }
 0x20e   :  { %158 = vrcp.f32 %v110_v19 }
 0x218   :  { %v159_v20 = vpop.eup %158 }
 0x219   :  { %v112_v21 = vmul.f32 %v159_v20, %v157_v17 }
 0x21b   :  { %113 = vst.msk [vmem:[#allocation2] sm:$0xff] %vm101_vm2, %v112_v21 }
 0x21c   :  { %171 = shalt.err (!%p168_p4)
}
 0x21d   :  { %s172_s26 = scalar_lea.hbm %s244_s3, 128 }
 0x21e   :  { %p173_p5 = scmp.ne.s32.totalorder %s244_s3, %s172_s26  ;;  %p176_p6 = scmp.lt.u32.totalorder %s172_s26, %s244_s3 }
 0x220   :  { %p178_p7 = pnand %p176_p6, %p173_p5 }
 0x222   :  { %181 = shalt.err (!%p178_p7)
}
 0x223   :  { %123 = dma.vmem_to_hbm [thread:$0]  %s121_s1, 128, %s244_s3, [#allocation3]  }
 0x224   :  { %182 = dma.done.wait [#allocation3], 128  }
 0x225   :  { %183 = vsyncadd [#allocation3], 4294967168 }
 0x226   :  { %127 = vsyncpa [#allocation3], 1 }

</bundles_post_ra>
